<compile_context>
chip_gen: v7x
topology: tpu7x:2x2x1
jax: 0.10.0
libtpu: 0.0.40
codegen_flags: <defaults>
</compile_context>

<pallas_src>
import jax
import jax.numpy as jnp
from jax.experimental import pallas as pl
from jax.experimental.pallas import tpu as pltpu

_MIB = 1024 * 1024


# --------------------------------------------------------------------------- #
# Kernel
# --------------------------------------------------------------------------- #
def _make_kernel(d, per_slab_stores, write_att1, mxu_dtype, approx_recip):
    def kernel(h_ref, u_ref, wh_ref, wu_ref, whu_ref, b_ref, *out_refs):
        if write_att1:
            att1_ref, att2_ref, g_ref = out_refs
        else:
            att2_ref, g_ref = out_refs

        h = h_ref[...]                       # (Bb, T, d)  caller dtype
        u = u_ref[...]                       # (Bb, J, d)
        wh = wh_ref[...]                     # (1, d)  f32
        wu = wu_ref[...]                     # (1, d)  f32
        whu = whu_ref[...]                   # (1, d)  f32
        bias = b_ref[0]                      # scalar from SMEM

        mm_dt = mxu_dtype if mxu_dtype is not None else h.dtype
        u_mm = u.astype(mm_dt)

        # ---- scores: s = (H*w_hu + w_u) @ U^T + H·w_h + bias ---------------
        hf = h.astype(jnp.float32)           # score-phase f32 view of H
        hw = (hf * whu[None] + wu[None]).astype(mm_dt)
        row_bias = jnp.sum(hf * wh[None], axis=-1, keepdims=True) + bias
        s = jnp.einsum('btd,bjd->btj', hw, u_mm,
                       preferred_element_type=jnp.float32)        # (Bb, T, J)
        s = s + row_bias

        # ---- softmax over the query axis (dim 2) ---------------------------
        m1 = jnp.max(s, axis=-1, keepdims=True)                   # (Bb, T, 1)
        e1 = jnp.exp(s - m1)
        att1 = e1 * pl.reciprocal(jnp.sum(e1, axis=-1, keepdims=True),
                                  approx=approx_recip)

        # ---- softmax over the context axis of the row-max (reuse m1) -------
        m2 = jnp.max(m1, axis=1, keepdims=True)                   # (Bb, 1, 1)
        e2 = jnp.exp(m1 - m2)                                     # (Bb, T, 1)
        att2_col = e2 * pl.reciprocal(jnp.sum(e2, axis=1, keepdims=True),
                                      approx=approx_recip)        # (Bb, T, 1)

        # ---- aggregations ---------------------------------------------------
        agg1 = jnp.einsum('btj,bjd->btd', att1.astype(mm_dt), u_mm,
                          preferred_element_type=jnp.float32)     # (Bb, T, d)
        # att2 @ H as a VPU multiply + sublane reduce (avoids an M=1 MXU pass)
        agg2 = jnp.sum(att2_col * h.astype(jnp.float32),
                       axis=1, keepdims=True)                     # (Bb, 1, d)

        # ---- stores ---------------------------------------------------------
        if write_att1:
            att1_ref[...] = att1.astype(att1_ref.dtype)
        # att2 stored as a column; the (B,1,T) view is a wrapper-side reshape.
        att2_ref[...] = att2_col.astype(att2_ref.dtype)           # (Bb, T, 1)

        gdt = g_ref.dtype
        hg = h.astype(jnp.float32)   # local recast: no persistent f32 H copy
        slab0 = h.astype(gdt)
        slab1 = agg1.astype(gdt)
        slab2 = (hg * agg1).astype(gdt)
        slab3 = (hg * agg2).astype(gdt)
        if per_slab_stores:
            # d % 128 == 0: the four slice stores are already lane-aligned.
            g_ref[:, :, 0 * d:1 * d] = slab0
            g_ref[:, :, 1 * d:2 * d] = slab1
            g_ref[:, :, 2 * d:3 * d] = slab2
            g_ref[:, :, 3 * d:4 * d] = slab3
        else:
            # Assemble one lane-contiguous (T, 4d) slab -> single wide store.
            g_ref[...] = jnp.concatenate([slab0, slab1, slab2, slab3], axis=-1)

    return kernel


# --------------------------------------------------------------------------- #
# VMEM planning
# --------------------------------------------------------------------------- #
def _working_set_bytes(bb, T, J, d, itemsize):
    """Rough per-grid-step VMEM working set (inputs + outputs double-buffered
    plus f32 intermediates)."""
    per_b = ((T + J) * d * itemsize                  # H, U input blocks
             + (T * J + T + 4 * T * d) * itemsize    # att1, att2, G blocks
             + (6 * T * d + 3 * T * J) * 4)          # f32 intermediates (rough)
    return 2 * bb * per_b                            # x2: double buffering


def _vmem_plan():
    """Generation-aware (physical_cap, scoped_limit, planning_budget)."""
    try:
        cap = int(pltpu.get_tpu_info().vmem_capacity_bytes)
    except Exception:
        cap = 64 * _MIB                      # conservative (v7x-sized) fallback
    if cap >= 96 * _MIB:                     # v5e / v6e: 128 MiB physical
        return cap, 96 * _MIB, 72 * _MIB
    return cap, 40 * _MIB, 32 * _MIB         # v7x: 64 MiB physical per TC


def _pick_block_b(B, T, J, d, itemsize, budget_bytes):
    """Largest divisor of B that fits the budget, preferring a grid with >= 2
    (ideally an even number of) steps so both v7x TensorCores get work and the
    software pipeline has depth."""
    divisors = [x for x in range(1, B + 1) if B % x == 0]
    fitting = [x for x in divisors
               if _working_set_bytes(x, T, J, d, itemsize) <= budget_bytes]
    if not fitting:
        return 1          # even block_b=1 over budget; wrapper bumps the limit
    if B >= 2:
        multi = [x for x in fitting if B // x >= 2]
        if multi:
            even = [x for x in multi if (B // x) % 2 == 0]
            return max(even) if even else max(multi)
    return max(fitting)


# --------------------------------------------------------------------------- #
# Wrapper
# --------------------------------------------------------------------------- #
def biattention(H, U, w_hu_weight, w_hu_bias, *, block_b=None,
                vmem_limit_bytes=None, mxu_dtype=None,
                return_att1=True, approx_reciprocal=True):
    """H: (B, T, d), U: (B, J, d), w_hu_weight: (1, 3d), w_hu_bias: (1,).

    Returns (att1, att2, G) (or (att2, G) if return_att1=False) in H.dtype,
    so a bf16 caller gets bf16 HBM traffic on the big tensors while
    accumulation stays f32 inside the kernel.
    """
    B, T, d = H.shape
    _, J, _ = U.shape
    assert U.shape[0] == B and U.shape[2] == d
    assert w_hu_weight.shape == (1, 3 * d)
    out_dtype = H.dtype
    itemsize = jnp.dtype(out_dtype).itemsize

    # Split Linear(3d -> 1) weight, matching the concat order [H, U, H*U].
    wh = w_hu_weight[:, 0 * d:1 * d].astype(jnp.float32)     # (1, d)
    wu = w_hu_weight[:, 1 * d:2 * d].astype(jnp.float32)     # (1, d)
    whu = w_hu_weight[:, 2 * d:3 * d].astype(jnp.float32)    # (1, d)
    bias = jnp.asarray(w_hu_bias, jnp.float32).reshape((1,))  # SMEM scalar

    cap, limit, budget = _vmem_plan()
    if block_b is None:
        block_b = _pick_block_b(B, T, J, d, itemsize, budget)
    assert B % block_b == 0
    grid = (B // block_b,)

    if vmem_limit_bytes is None:
        vmem_limit_bytes = limit
        est = _working_set_bytes(block_b, T, J, d, itemsize)
        if est > vmem_limit_bytes:
            # No batch tiling left (block_b == 1 and still over budget): ask
            # for as much scoped VMEM as the part has, minus headroom.
            # TODO(synk): tile the context axis (T) with a running att2
            # max/sum accumulator for shapes whose single-batch block exceeds
            # physical VMEM.
            vmem_limit_bytes = max(vmem_limit_bytes,
                                   min(int(est * 1.25), cap - 4 * _MIB))

    per_slab_stores = (d % 128 == 0)
    kernel = _make_kernel(d, per_slab_stores, return_att1, mxu_dtype,
                          approx_reciprocal)

    in_specs = [
        pl.BlockSpec((block_b, T, d), lambda b: (b, 0, 0)),   # H
        pl.BlockSpec((block_b, J, d), lambda b: (b, 0, 0)),   # U
        pl.BlockSpec((1, d), lambda b: (0, 0)),               # w_h
        pl.BlockSpec((1, d), lambda b: (0, 0)),               # w_u
        pl.BlockSpec((1, d), lambda b: (0, 0)),               # w_hu
        pl.BlockSpec(memory_space=pltpu.MemorySpace.SMEM),    # bias scalar
    ]

    out_shapes = []
    out_specs = []
    if return_att1:
        out_shapes.append(jax.ShapeDtypeStruct((B, T, J), out_dtype))
        out_specs.append(pl.BlockSpec((block_b, T, J), lambda b: (b, 0, 0)))
    out_shapes.append(jax.ShapeDtypeStruct((B, T, 1), out_dtype))       # att2
    out_specs.append(pl.BlockSpec((block_b, T, 1), lambda b: (b, 0, 0)))
    out_shapes.append(jax.ShapeDtypeStruct((B, T, 4 * d), out_dtype))   # G
    out_specs.append(pl.BlockSpec((block_b, T, 4 * d), lambda b: (b, 0, 0)))

    # TODO(synk): the torch module also stashes raw scores1 on self.shared
    # (Python side effect); not emitted here.
    outs = pl.pallas_call(
        kernel,
        grid=grid,
        in_specs=in_specs,
        out_specs=tuple(out_specs),
        out_shape=tuple(out_shapes),
        compiler_params=pltpu.CompilerParams(
            dimension_semantics=("parallel",),
            vmem_limit_bytes=int(vmem_limit_bytes)),
    )(H, U, wh, wu, whu, bias)

    if return_att1:
        att1, att2_col, G = outs
    else:
        att2_col, G = outs

    # (B, T, 1) -> (B, 1, T): identical row-major data order, so this is a
    # free metadata reshape in the wrapper instead of an in-kernel XLU
    # relayout + lane-sparse (1, T) store.
    att2 = att2_col.reshape(B, 1, T)

    if return_att1:
        return att1, att2, G
    return att2, G


# --------------------------------------------------------------------------- #
# Pure-JAX reference (mirrors the PyTorch forward)
# --------------------------------------------------------------------------- #
def biattention_ref(H, U, w_hu_weight, w_hu_bias):
    B, T, d = H.shape
    J = U.shape[1]
    H_up = jnp.broadcast_to(H[:, :, None, :], (B, T, J, d))
    U_up = jnp.broadcast_to(U[:, None, :, :], (B, T, J, d))
    HU_phi = jnp.concatenate([H_up, U_up, H_up * U_up], axis=3)          # (B,T,J,3d)
    scores1 = (HU_phi.reshape(B * T * J, 3 * d) @ w_hu_weight.T
               + w_hu_bias).reshape(B, T, J)
    att1 = jax.nn.softmax(scores1, axis=2)
    att2 = jax.nn.softmax(jnp.max(scores1, axis=2), axis=1)[:, None, :]  # (B,1,T)
    agg1 = jnp.einsum('btj,bjd->btd', att1, U)
    agg2 = jnp.einsum('bot,btd->bod', att2, H)                           # (B,1,d)
    agg2 = jnp.broadcast_to(agg2, (B, T, d))
    G = jnp.concatenate([H, agg1, H * agg1, H * agg2], axis=2)
    return att1, att2, G


if __name__ == "__main__":
    # Small shapes consistent with the module: batch=2, context_l=16,
    # query_l=8, hidden_size=32.
    B, T, J, d = 2, 16, 8, 32

    key = jax.random.PRNGKey(0)
    k_h, k_u, k_w, k_b = jax.random.split(key, 4)
    H = jax.random.normal(k_h, (B, T, d), dtype=jnp.float32)
    U = jax.random.normal(k_u, (B, J, d), dtype=jnp.float32)

    # Deterministic Linear(3d -> 1) parameters (uniform like torch default).
    bound = 1.0 / jnp.sqrt(3.0 * d)
    w_hu_weight = jax.random.uniform(k_w, (1, 3 * d), jnp.float32, -bound, bound)
    w_hu_bias = jax.random.uniform(k_b, (1,), jnp.float32, -bound, bound)

    att1_r, att2_r, G_r = biattention_ref(H, U, w_hu_weight, w_hu_bias)

    # f32 path (tight-ish tolerances; approx reciprocal in the softmaxes).
    att1, att2, G = biattention(H, U, w_hu_weight, w_hu_bias)
    jax.block_until_ready((att1, att2, G))
    assert att2.shape == (B, 1, T) and G.shape == (B, T, 4 * d)
    assert jnp.allclose(att1, att1_r, atol=5e-3, rtol=5e-3)
    assert jnp.allclose(att2, att2_r, atol=5e-3, rtol=5e-3)
    assert jnp.allclose(G, G_r, atol=2e-2, rtol=2e-2)

    # att1-less path (skips the pure-writeback att1 output).
    att2_n, G_n = biattention(H, U, w_hu_weight, w_hu_bias, return_att1=False)
    jax.block_until_ready((att2_n, G_n))
    assert jnp.allclose(att2_n, att2_r, atol=5e-3, rtol=5e-3)
    assert jnp.allclose(G_n, G_r, atol=2e-2, rtol=2e-2)

    # bf16 HBM-facing path (the perf configuration): smoke run + loose check.
    att1_b, att2_b, G_b = biattention(H.astype(jnp.bfloat16),
                                      U.astype(jnp.bfloat16),
                                      w_hu_weight, w_hu_bias)
    jax.block_until_ready((att1_b, att2_b, G_b))
    assert jnp.allclose(att1_b.astype(jnp.float32), att1_r, atol=5e-2, rtol=5e-2)
    assert jnp.all(jnp.isfinite(G_b.astype(jnp.float32)))

    # Flag-guarded bf16 MXU operands with an f32 caller (f32 accumulation).
    att1_m, att2_m, G_m = biattention(H, U, w_hu_weight, w_hu_bias,
                                      mxu_dtype=jnp.bfloat16)
    jax.block_until_ready((att1_m, att2_m, G_m))
    assert jnp.allclose(att1_m, att1_r, atol=5e-2, rtol=5e-2)
    assert jnp.all(jnp.isfinite(G_m))

    print("KERNEL_OK")
</pallas_src>

<mosaic_0001>
module attributes {stable_mosaic.version = 11 : i64} {
  func.func @kernel(%arg0: i32, %arg1: memref<1x16x32xf32, #tpu.memory_space<vmem>>, %arg2: memref<1x8x32xf32, #tpu.memory_space<vmem>>, %arg3: memref<1x32xf32, #tpu.memory_space<vmem>>, %arg4: memref<1x32xf32, #tpu.memory_space<vmem>>, %arg5: memref<1x32xf32, #tpu.memory_space<vmem>>, %arg6: memref<1xf32, #tpu.memory_space<smem>>, %arg7: memref<1x16x8xf32, #tpu.memory_space<vmem>>, %arg8: memref<1x16x1xf32, #tpu.memory_space<vmem>>, %arg9: memref<1x16x128xf32, #tpu.memory_space<vmem>>) attributes {dimension_semantics = [#tpu.dimension_semantics<parallel>], iteration_bounds = array<i64: 2>, scalar_prefetch = 0 : i64, scratch_operands = 0 : i64, tpu.core_type = #tpu.core_type<tc>, window_params = [{transform_indices = @transform_0, window_bounds = array<i64: 1, 16, 32>}, {transform_indices = @transform_1, window_bounds = array<i64: 1, 8, 32>}, {pipeline_mode = #tpu.pipeline_mode<synchronous>, transform_indices = @transform_2, window_bounds = array<i64: 1, 32>}, {pipeline_mode = #tpu.pipeline_mode<synchronous>, transform_indices = @transform_3, window_bounds = array<i64: 1, 32>}, {pipeline_mode = #tpu.pipeline_mode<synchronous>, transform_indices = @transform_4, window_bounds = array<i64: 1, 32>}, {transform_indices = @transform_5, window_bounds = array<i64: 1>}, {transform_indices = @transform_6, window_bounds = array<i64: 1, 16, 8>}, {transform_indices = @transform_7, window_bounds = array<i64: 1, 16, 1>}, {transform_indices = @transform_8, window_bounds = array<i64: 1, 16, 128>}]} {
    %c0 = arith.constant 0 : index
    %c0_0 = arith.constant 0 : index
    %c0_1 = arith.constant 0 : index
    %0 = vector.load %arg1[%c0, %c0_0, %c0_1] : memref<1x16x32xf32, #tpu.memory_space<vmem>>, vector<1x16x32xf32>
    %c0_2 = arith.constant 0 : index
    %c0_3 = arith.constant 0 : index
    %c0_4 = arith.constant 0 : index
    %1 = vector.load %arg2[%c0_2, %c0_3, %c0_4] : memref<1x8x32xf32, #tpu.memory_space<vmem>>, vector<1x8x32xf32>
    %c0_5 = arith.constant 0 : index
    %c0_6 = arith.constant 0 : index
    %2 = vector.load %arg3[%c0_5, %c0_6] : memref<1x32xf32, #tpu.memory_space<vmem>>, vector<1x32xf32>
    %c0_7 = arith.constant 0 : index
    %c0_8 = arith.constant 0 : index
    %3 = vector.load %arg4[%c0_7, %c0_8] : memref<1x32xf32, #tpu.memory_space<vmem>>, vector<1x32xf32>
    %c0_9 = arith.constant 0 : index
    %c0_10 = arith.constant 0 : index
    %4 = vector.load %arg5[%c0_9, %c0_10] : memref<1x32xf32, #tpu.memory_space<vmem>>, vector<1x32xf32>
    %c0_11 = arith.constant 0 : index
    %5 = memref.load %arg6[%c0_11] : memref<1xf32, #tpu.memory_space<smem>>
    %6 = vector.shape_cast %4 : vector<1x32xf32> to vector<1x1x32xf32>
    %7 = vector.broadcast %6 : vector<1x1x32xf32> to vector<1x16x32xf32>
    %8 = arith.mulf %0, %7 : vector<1x16x32xf32>
    %9 = vector.shape_cast %3 : vector<1x32xf32> to vector<1x1x32xf32>
    %10 = vector.broadcast %9 : vector<1x1x32xf32> to vector<1x16x32xf32>
    %11 = arith.addf %8, %10 : vector<1x16x32xf32>
    %12 = vector.shape_cast %2 : vector<1x32xf32> to vector<1x1x32xf32>
    %13 = vector.broadcast %12 : vector<1x1x32xf32> to vector<1x16x32xf32>
    %14 = arith.mulf %0, %13 : vector<1x16x32xf32>
    %cst = arith.constant dense<0.000000e+00> : vector<1x16xf32>
    %15 = vector.multi_reduction <add>, %14, %cst [2] : vector<1x16x32xf32> to vector<1x16xf32>
    %16 = vector.shape_cast %15 : vector<1x16xf32> to vector<1x16x1xf32>
    %17 = vector.broadcast %5 : f32 to vector<1x16x1xf32>
    %18 = arith.addf %16, %17 : vector<1x16x1xf32>
    "tpu.trace_start"() <{level = 10 : i32, message = "btd,bjd->btj"}> : () -> ()
    %cst_12 = arith.constant dense<0.000000e+00> : vector<1x16x8xf32>
    %19 = tpu.matmul %11, %1, %cst_12 {dimension_numbers = #tpu.dot_dimension_numbers<[2], [2], [1], [1], [0, 0, 0, 1, 1, 1], [0], [0]>} : vector<1x16x32xf32>, vector<1x8x32xf32>, vector<1x16x8xf32> -> vector<1x16x8xf32>
    "tpu.trace_stop"() : () -> ()
    %20 = vector.broadcast %18 : vector<1x16x1xf32> to vector<1x16x8xf32>
    %21 = arith.addf %19, %20 : vector<1x16x8xf32>
    %cst_13 = arith.constant dense<0xFF800000> : vector<1x16xf32>
    %22 = vector.multi_reduction <maximumf>, %21, %cst_13 [2] : vector<1x16x8xf32> to vector<1x16xf32>
    %23 = vector.shape_cast %22 : vector<1x16xf32> to vector<1x16x1xf32>
    %24 = vector.broadcast %23 : vector<1x16x1xf32> to vector<1x16x8xf32>
    %25 = arith.subf %21, %24 : vector<1x16x8xf32>
    %26 = math.exp %25 : vector<1x16x8xf32>
    %cst_14 = arith.constant dense<0.000000e+00> : vector<1x16xf32>
    %27 = vector.multi_reduction <add>, %26, %cst_14 [2] : vector<1x16x8xf32> to vector<1x16xf32>
    %28 = vector.shape_cast %27 : vector<1x16xf32> to vector<1x16x1xf32>
    %29 = tpu.reciprocal %28 {approx = true} : vector<1x16x1xf32> -> vector<1x16x1xf32>
    %30 = vector.broadcast %29 : vector<1x16x1xf32> to vector<1x16x8xf32>
    %31 = arith.mulf %26, %30 : vector<1x16x8xf32>
    %cst_15 = arith.constant dense<0xFF800000> : vector<1x1xf32>
    %32 = vector.multi_reduction <maximumf>, %23, %cst_15 [1] : vector<1x16x1xf32> to vector<1x1xf32>
    %33 = vector.shape_cast %32 : vector<1x1xf32> to vector<1x1x1xf32>
    %34 = vector.broadcast %33 : vector<1x1x1xf32> to vector<1x16x1xf32>
    %35 = arith.subf %23, %34 : vector<1x16x1xf32>
    %36 = math.exp %35 : vector<1x16x1xf32>
    %cst_16 = arith.constant dense<0.000000e+00> : vector<1x1xf32>
    %37 = vector.multi_reduction <add>, %36, %cst_16 [1] : vector<1x16x1xf32> to vector<1x1xf32>
    %38 = vector.shape_cast %37 : vector<1x1xf32> to vector<1x1x1xf32>
    %39 = tpu.reciprocal %38 {approx = true} : vector<1x1x1xf32> -> vector<1x1x1xf32>
    %40 = vector.broadcast %39 : vector<1x1x1xf32> to vector<1x16x1xf32>
    %41 = arith.mulf %36, %40 : vector<1x16x1xf32>
    "tpu.trace_start"() <{level = 10 : i32, message = "btj,bjd->btd"}> : () -> ()
    %cst_17 = arith.constant dense<0.000000e+00> : vector<1x16x32xf32>
    %42 = tpu.matmul %31, %1, %cst_17 {dimension_numbers = #tpu.dot_dimension_numbers<[2], [1], [1], [2], [0, 0, 0, 1, 1, 2], [0], [0]>} : vector<1x16x8xf32>, vector<1x8x32xf32>, vector<1x16x32xf32> -> vector<1x16x32xf32>
    "tpu.trace_stop"() : () -> ()
    %43 = vector.broadcast %41 : vector<1x16x1xf32> to vector<1x16x32xf32>
    %44 = arith.mulf %43, %0 : vector<1x16x32xf32>
    %cst_18 = arith.constant dense<0.000000e+00> : vector<1x32xf32>
    %45 = vector.multi_reduction <add>, %44, %cst_18 [1] : vector<1x16x32xf32> to vector<1x32xf32>
    %46 = vector.shape_cast %45 : vector<1x32xf32> to vector<1x1x32xf32>
    %c0_19 = arith.constant 0 : index
    %c0_20 = arith.constant 0 : index
    %c0_21 = arith.constant 0 : index
    %47 = vector.load %arg7[%c0_19, %c0_20, %c0_21] : memref<1x16x8xf32, #tpu.memory_space<vmem>>, vector<1x16x8xf32>
    tpu.vector_store %arg7[%c0_19, %c0_20, %c0_21], %31 {strides = array<i32>} : memref<1x16x8xf32, #tpu.memory_space<vmem>>, vector<1x16x8xf32>,
    %c0_22 = arith.constant 0 : index
    %c0_23 = arith.constant 0 : index
    %c0_24 = arith.constant 0 : index
    %48 = vector.load %arg8[%c0_22, %c0_23, %c0_24] : memref<1x16x1xf32, #tpu.memory_space<vmem>>, vector<1x16x1xf32>
    tpu.vector_store %arg8[%c0_22, %c0_23, %c0_24], %41 {strides = array<i32>} : memref<1x16x1xf32, #tpu.memory_space<vmem>>, vector<1x16x1xf32>,
    %49 = arith.mulf %0, %42 : vector<1x16x32xf32>
    %50 = vector.broadcast %46 : vector<1x1x32xf32> to vector<1x16x32xf32>
    %51 = arith.mulf %0, %50 : vector<1x16x32xf32>
    %52 = tpu.concatenate %0, %42, %49, %51 in 2 : vector<1x16x32xf32>, vector<1x16x32xf32>, vector<1x16x32xf32>, vector<1x16x32xf32> -> vector<1x16x128xf32>
    %c0_25 = arith.constant 0 : index
    %c0_26 = arith.constant 0 : index
    %c0_27 = arith.constant 0 : index
    %53 = vector.load %arg9[%c0_25, %c0_26, %c0_27] : memref<1x16x128xf32, #tpu.memory_space<vmem>>, vector<1x16x128xf32>
    tpu.vector_store %arg9[%c0_25, %c0_26, %c0_27], %52 {strides = array<i32>} : memref<1x16x128xf32, #tpu.memory_space<vmem>>, vector<1x16x128xf32>,
    return
  }
  func.func @transform_0(%arg0: i32) -> (i32, i32, i32) {
    %c0_i32 = arith.constant 0 : i32
    %c0_i32_0 = arith.constant 0 : i32
    %c0_i32_1 = arith.constant 0 : i32
    return %arg0, %c0_i32, %c0_i32_0 : i32, i32, i32
  }
  func.func @transform_1(%arg0: i32) -> (i32, i32, i32) {
    %c0_i32 = arith.constant 0 : i32
    %c0_i32_0 = arith.constant 0 : i32
    %c0_i32_1 = arith.constant 0 : i32
    return %arg0, %c0_i32, %c0_i32_0 : i32, i32, i32
  }
  func.func @transform_2(%arg0: i32) -> (i32, i32) {
    %c0_i32 = arith.constant 0 : i32
    %c0_i32_0 = arith.constant 0 : i32
    %c0_i32_1 = arith.constant 0 : i32
    return %c0_i32, %c0_i32_0 : i32, i32
  }
  func.func @transform_3(%arg0: i32) -> (i32, i32) {
    %c0_i32 = arith.constant 0 : i32
    %c0_i32_0 = arith.constant 0 : i32
    %c0_i32_1 = arith.constant 0 : i32
    return %c0_i32, %c0_i32_0 : i32, i32
  }
  func.func @transform_4(%arg0: i32) -> (i32, i32) {
    %c0_i32 = arith.constant 0 : i32
    %c0_i32_0 = arith.constant 0 : i32
    %c0_i32_1 = arith.constant 0 : i32
    return %c0_i32, %c0_i32_0 : i32, i32
  }
  func.func @transform_5(%arg0: i32) -> i32 {
    %c0_i32 = arith.constant 0 : i32
    %c0_i32_0 = arith.constant 0 : i32
    return %c0_i32 : i32
  }
  func.func @transform_6(%arg0: i32) -> (i32, i32, i32) {
    %c0_i32 = arith.constant 0 : i32
    %c0_i32_0 = arith.constant 0 : i32
    %c0_i32_1 = arith.constant 0 : i32
    return %arg0, %c0_i32, %c0_i32_0 : i32, i32, i32
  }
  func.func @transform_7(%arg0: i32) -> (i32, i32, i32) {
    %c0_i32 = arith.constant 0 : i32
    %c0_i32_0 = arith.constant 0 : i32
    %c0_i32_1 = arith.constant 0 : i32
    return %arg0, %c0_i32, %c0_i32_0 : i32, i32, i32
  }
  func.func @transform_8(%arg0: i32) -> (i32, i32, i32) {
    %c0_i32 = arith.constant 0 : i32
    %c0_i32_0 = arith.constant 0 : i32
    %c0_i32_1 = arith.constant 0 : i32
    return %arg0, %c0_i32, %c0_i32_0 : i32, i32, i32
  }
}

</mosaic_0001>

<bundles_post_ra>
// kernel: tpu_custom_call.1
= control target key start
LH: loop header
LB: loop body
LE: loop exit
PB: predicated region body
PF: predicated region fallthrough
CT: control target
= control target key end

     0   :  { %s1441_s0 = inlined_call_operand.hbm [shape: f32[2,16,32], index: 0, kind: input, shape index: {}]   ;;  %s1442_s1 = inlined_call_operand.hbm [shape: f32[2,8,32], index: 1, kind: input, shape index: {}]   ;;  %s1443_s2 = inlined_call_operand.vmem [shape: f32[1,32], index: 2, kind: input, shape index: {}]   ;;  %s1444_s3 = inlined_call_operand.vmem [shape: f32[1,32], index: 3, kind: input, shape index: {}]   ;;  %s1445_s4 = inlined_call_operand.vmem [shape: f32[1,32], index: 4, kind: input, shape index: {}]   ;;  %s1446_s5 = inlined_call_operand.<no memory space> [shape: f32[1], index: 5, kind: input, shape index: {}]   ;;  %s1447_s6 = inlined_call_operand.vmem [shape: f32[2,16,8], index: 6, kind: output, shape index: {0}]   ;;  %s1448_s7 = inlined_call_operand.vmem [shape: f32[2,16,1], index: 7, kind: output, shape index: {1}]   ;;  %s1449_s8 = inlined_call_operand.hbm [shape: f32[2,16,128], index: 8, kind: output, shape index: {2}]  }
   0x1   :  { %1452 = sst [smem:[#allocation13_spill]] %s1441_s0 }
   0x2   :  { %14 = sst [smem:[#allocation2]] %s1446_s5 }
   0x3   :  { %15 = vsyncpa [#allocation4], 0 }
   0x4   :  { %17 = vsyncpa [#allocation4 + $0x1], 0 }
   0x5   :  { %18 = vsyncpa [#allocation7], 0 }
   0x6   :  { %20 = vsyncpa [#allocation7 + $0x1], 0 }
   0x7   :  { %21 = vsyncpa [#allocation5], 0 }
   0x8   :  { %23 = vsyncpa [#allocation5 + $0x1], 0  ;;  %s1180_s29 = smov 0   ;;  %s1182_s30 = smov 0  }
   0x9   :  { %s1184_s9 = smov 0   ;;  %s1186_s10 = smov 0  }
   0xa LB: > { %s1201_s5 = sadd.s32 4294967295, %s1120_s10   ;;  %s869_s11 = sadd.s32 4294967294, %s1120_s10   ;;  %s1120_s10 = sphi %s1186_s10, %s1470_s10   ;;  %s1116_s9 = sphi %s1184_s9, %s1469_s9   ;;  %s1112_s30 = sphi %s1182_s30, %s1468_s30   ;;  %s1108_s29 = sphi %s1180_s29, %s1467_s29  }
   0xb   : > { %s1205_s12 = sadd.s32 1, %s1120_s10   ;;  %s36_s13 = sadd.s32 1, %s1116_s9 }
   0xc   : > { %s33_s14 = ssub.s32 %s1120_s10, %s1205_s12  ;;  %p43_p0 = scmp.ne.s32.totalorder %s1116_s9, %s1112_s30 }
   0xd   : > { %p34_p1 = scmp.eq.s32.totalorder %s33_s14, 0  ;;  %p44_p2 = scmp.eq.s32.totalorder %s1120_s10, 0 }
   0xe   : > { %p49_p3 = scmp.ne.s32.totalorder %s1112_s30, %s1108_s29  ;;  %p50_p4 = scmp.eq.s32.totalorder %s1201_s5, 0 }
   0xf   : > { %s1217_s15 = scalar_select %p34_p1, %s1116_s9, %s36_s13  }
  0x10   : > { %p1219_p5 = por %p44_p2, %p43_p0  ;;  %p1223_p6 = por %p50_p4, %p49_p3 }
  0x11   : > { %1453 = sst [smem:[#allocation12_spill]] %s1217_s15  ;;  %p235_p7 = scmp.eq.s32.totalorder %s1201_s5, 1 }
  0x12   : > { %s1455_s17 = scalar_select %p1223_p6, 1, 0 }
  0x13   : > { %p241_p8 = scmp.eq.s32.totalorder %s869_s11, 1  ;;  %p935_p10 = scmp.lt.s32.totalorder %s1120_s10, 2 }
  0x14   : > { %p1230_p11 = por %p235_p7, %p43_p0  ;;  %s1239_s20 = sand.u32 1, %s1116_s9  }
  0x15   : > { %p1234_p12 = por %p241_p8, %p49_p3  ;;  %s898_s21 = sshll.u32 %s1120_s10, 8 }
  0x16   : > { %s1456_s18 = scalar_select %p1230_p11, 1, 0 }
  0x17   : > { %s1457_s19 = scalar_select %p1234_p12, 1, 0 }
  0x18   : > { %s872_s22 = sshll.u32 %s1239_s20, 4  ;;  %s1458_s0 = sld [smem:[#allocation13_spill]] }
  0x19   : > { %s277_s26 = scalar_lea.vmem [#allocation3], %s872_s22  ;;  %p1250_p13 = pnand %p935_p10, %p1219_p5 }
  0x1a   : > { %s284_s27 = sshll.u32 %s277_s26, 4  ;;  %s274_s11 = scalar_lea.sflag [#allocation4], %s1239_s20  ;;  %s1254_s27 = int_to_ptr.vmem [resolvable:$true] %s284_s27 }
  0x1b   : > { %p992_p1 = pneg %p1250_p13 }
  0x1e   : > { %s1246_s25 = scalar_lea.hbm %s1458_s0, %s898_s21  ;;  %s995_s16 = scalar_lea.hbm %s1458_s0, 512 }
  0x1f   : > { %s990_s13 = scalar_lea.hbm %s1246_s25, 256  ;;  %p996_p4 = scmp.lt.u32.totalorder %s1246_s25, %s1458_s0 }
  0x20   : > { %p991_p0 = scmp.ne.s32.totalorder %s1246_s25, %s990_s13  ;;  %p997_p5 = scmp.lt.u32.totalorder %s995_s16, %s990_s13 }
  0x21   : > { %p999_p8 = scmp.lt.u32.totalorder %s990_s13, %s1246_s25 }
  0x22   : > { %p993_p2 = pnand %p992_p1, %p991_p0  ;;  %p998_p7 = por %p997_p5, %p996_p4 }
  0x24   : > { %p994_p3 = pneg %p993_p2  ;;  %p1000_p10 = por %p999_p8, %p998_p7 }
  0x26   : > { %p1001_p9 = pnand %p1000_p10, %p994_p3 }
  0x28   : > { %1004 = shalt.err (!%p1001_p9)
}
  0x29   : > { %s1005_s24 = scalar_lea.vmem %s1254_s27, 256  ;;  %s1122_s26 = smov [#allocation3]  }
  0x2a   : > { %p1006_p0 = scmp.ne.s32.totalorder %s1254_s27, %s1005_s24  ;;  %s1010_s14 = sshll.u32 %s1122_s26, 4  ;;  %s1011_s14 = int_to_ptr.vmem [resolvable:$false] %s1010_s14 }
  0x2b   : > { %s1012_s21 = scalar_lea.vmem %s1011_s14, 512  ;;  %p1013_p11 = scmp.lt.s32.totalorder %s1254_s27, %s1011_s14 }
  0x2c   : > { %p1008_p2 = pnand %p1006_p0, %p992_p1  ;;  %p1014_p4 = scmp.lt.s32.totalorder %s1012_s21, %s1005_s24 }
  0x2e   : > { %p1009_p12 = pneg %p1008_p2  ;;  %p1015_p5 = por %p1014_p4, %p1013_p11 }
  0x30   : > { %p1016_p7 = pnand %p1015_p5, %p1009_p12 }
  0x32   : > { %1019 = shalt.err (!%p1016_p7)
}
  0x33   : > { %s1123_s13 = smov 128   ;;  %s1124_s16 = smov 8  }
  0x34   : > { %927 = dma.hbm_to_vmem [thread:$0]  (!%p1250_p13), %s1246_s25, 256, %s1254_s27, %s274_s11, %s1123_s13, %s1123_s13, %s1124_s16  }
  0x35   : > { %p877_p9 = scmp.ge.s32.totalorder %s1120_s10, 1  ;;  %p310_p3 = scmp.lt.s32.totalorder %s1120_s10, 3 }
  0x36   : > { %s875_s22 = sshll.u32 %s1239_s20, 3  ;;  %s876_s24 = sshll.u32 %s1120_s10, 7 }
  0x37   : > { %p1287_p11 = pnand %p877_p9, %p310_p3  ;;  %s298_s26 = scalar_lea.vmem [#allocation6], %s875_s22 }
  0x38   : > { %s305_s14 = sshll.u32 %s298_s26, 4  ;;  %s1295_s15 = scalar_lea.hbm %s1442_s1, %s876_s24  ;;  %s306_s14 = int_to_ptr.vmem [resolvable:$true] %s305_s14 }
  0x39   : > { %s1460_s23 = scalar_select %p1287_p11, 1, 0 }
  0x3a   : > { %s295_s25 = scalar_lea.sflag [#allocation7], %s1239_s20  ;;  %s1020_s27 = scalar_lea.hbm %s1295_s15, 128 }
  0x3b   : > { %p1021_p12 = scmp.ne.s32.totalorder %s1295_s15, %s1020_s27  ;;  %s1025_s16 = scalar_lea.hbm %s1442_s1, 256 }
  0x3c   : > { %p1026_p0 = scmp.lt.u32.totalorder %s1295_s15, %s1442_s1  ;;  %p1027_p2 = scmp.lt.u32.totalorder %s1025_s16, %s1020_s27 }
  0x3d   : > { %p1023_p8 = pnand %p1021_p12, %p992_p1  ;;  %p1029_p5 = scmp.lt.u32.totalorder %s1020_s27, %s1295_s15 }
  0x3e   : > { %p1028_p4 = por %p1027_p2, %p1026_p0 }
  0x3f   : > { %p1024_p10 = pneg %p1023_p8 }
  0x40   : > { %p1030_p7 = por %p1029_p5, %p1028_p4 }
  0x42   : > { %p1031_p9 = pnand %p1030_p7, %p1024_p10 }
  0x44   : > { %1034 = shalt.err (!%p1031_p9)
}
  0x45   : > { %s1035_s20 = scalar_lea.vmem %s306_s14, 128  ;;  %s1125_s24 = smov [#allocation6]  }
  0x46   : > { %p1036_p3 = scmp.ne.s32.totalorder %s306_s14, %s1035_s20  ;;  %s1040_s26 = sshll.u32 %s1125_s24, 4  ;;  %s1041_s26 = int_to_ptr.vmem [resolvable:$false] %s1040_s26 }
  0x47   : > { %s1042_s21 = scalar_lea.vmem %s1041_s26, 256  ;;  %p1043_p6 = scmp.lt.s32.totalorder %s306_s14, %s1041_s26 }
  0x48   : > { %p1038_p12 = pnand %p1036_p3, %p992_p1  ;;  %p1044_p11 = scmp.lt.s32.totalorder %s1042_s21, %s1035_s20 }
  0x4a   : > { %p1039_p8 = pneg %p1038_p12  ;;  %p1045_p0 = por %p1044_p11, %p1043_p6 }
  0x4c   : > { %p1046_p2 = pnand %p1045_p0, %p1039_p8 }
  0x4e   : > { %1049 = shalt.err (!%p1046_p2)
}
  0x4f   : > { %930 = dma.hbm_to_vmem [thread:$0]  (!%p1250_p13), %s1295_s15, 128, %s306_s14, %s295_s25  }
  0x50   : > { %p1461_p10 = scmp.ne.s32.totalorder %s1460_s23, 0 }
  0x51   : > { %s1320_s27 = sand.u32 (!%p1461_p10), 1, %s1112_s30   ;;  %p1462_p6 = scmp.ne.s32.totalorder (!%p1461_p10), %s1455_s17, 0 }
  0x52   : > { %314 = sbr.rel (%p1461_p10) target bundleno = 990 (0x3de), region = 44  ;;  %s878_s11 = sshll.u32 (!%p1461_p10), %s1320_s27, 4 }
  0x53   : > { %s317_s13 = scalar_lea.sflag (!%p1461_p10), [#allocation4], %s1320_s27  ;;  %s320_s16 = scalar_lea.vmem (!%p1461_p10), [#allocation3], %s878_s11 }
  0x59   : > { %1095 = dma.done.wait (%p1462_p6), %s317_s13, 256  }
  0x5a   : > { %1097 = vsyncadd (%p1462_p6), %s317_s13, 4294967040  ;;  %s879_s15 = sshll.u32 %s1320_s27, 3  ;;  %s326_s28 = scalar_lea.sflag [#allocation7], %s1320_s27 }
  0x5b   : > { %s329_s23 = scalar_lea.vmem [#allocation6], %s879_s15 }
  0x5c   : > { %1099 = dma.done.wait (%p1462_p6), %s326_s28, 128  }
  0x5d   : > { %1101 = vsyncadd (%p1462_p6), %s326_s28, 4294967168  ;;  %vm418_vm0 = vcmask 261120   ;;  %v389_v0 = vld [vmem:[%s329_s23] sm:$0xff]  ;;  %v1338_v2 = vld [vmem:[%s320_s16 + $0x8] sm:$0xff]  ;;  %s393_s17 = sld [smem:[#allocation2]]  ;;  %vm512_vm1 = vcmask 64512  }
  0x5e   : > { %v1336_v1 = vld [vmem:[%s320_s16] sm:$0xff]  ;;  %908 = vmatprep.subr.msk.mxu0 %vm418_vm0, %v389_v0  ;;  %913 = vmatprep.subr.mxu1 %v389_v0  ;;  %p377_p13 = scmp.lt.s32.totalorder %s1201_s5, 1  ;;  %vm652_vm2 = vcmask 7168   ;;  %s1126_s25 = smov 32   ;;  %vm688_vm3 = vcmask 785408   ;;  %vm685_vm4 = vcmask 523264  }
  0x5f   : > { %v886_v3 = vld [vmem:[%s1444_s3] ss:$0 sm:$0xff]  ;;  %909 = vmatpush3.xpose.msk.msra.mxu0 %vm418_vm0, %v389_v0  ;;  %914 = vmatpush3.msra.mxu1 %v389_v0  ;;  %s1127_s22 = smov 64   ;;  %s1128_s0 = smov 96  }
  0x60   : > { %v885_v4 = vld [vmem:[%s1445_s4] ss:$0 sm:$0xff]  ;;  %s378_s26 = scalar_select %p377_p13, %s1201_s5, 1 }
  0x61   : > { %v887_v5 = vld [vmem:[%s1443_s2] ss:$0 sm:$0xff]  ;;  %v400_v6 = vmul.f32 %v885_v4, %v1336_v1  ;;  %v401_v7 = vmul.f32 %v885_v4, %v1338_v2  ;;  %s376_s20 = scalar_lea.vmem [#allocation8], %s878_s11  ;;  %p1463_p11 = scmp.ne.s32.totalorder %s1456_s18, 0 }
  0x62   : > { %v416_v8 = vmul.f32 %v887_v5, %v1336_v1  ;;  %v417_v9 = vmul.f32 %v887_v5, %v1338_v2  ;;  %s899_s21 = sshll.u32 %s378_s26, 4  ;;  %s723_s24 = sshll.u32 %s376_s20, 4  ;;  %s1388_s24 = int_to_ptr.vmem [resolvable:$true] %s723_s24 }
  0x63   : > { %v408_v10 = vadd.f32 %v886_v3, %v400_v6  ;;  %v409_v11 = vadd.f32 %v886_v3, %v401_v7  ;;  %v425_v15 = vstv %s393_s17  ;;  %s386_s15 = scalar_lea.vmem %s1448_s7, %s899_s21  ;;  %s381_s14 = scalar_lea.vmem %s1447_s6, %s899_s21 }
  0x64   : > { %v419_v12 = vsel %vm418_vm0, %v416_v8, 0.0  ;;  %v422_v13 = vsel %vm418_vm0, %v417_v9, 0.0  ;;  %s901_s17 = sshll.u32 %s1201_s5, 8  ;;  %s704_s5 = scalar_lea.sflag [#allocation5], %s1320_s27 }
  0x65   : > { %420 = vadd.xlane.f32.xlu0 %v419_v12  ;;  %910 = vmatprep.mubr.msk.f32.mxu0 %vm418_vm0, %v408_v10  ;;  %s1396_s21 = scalar_lea.hbm %s1449_s8, %s901_s17  ;;  %s1050_s13 = scalar_lea.vmem %s1388_s24, 256 }
  0x66   : > { %911 = vmatmul.mubr.msk.f32.vlgmr.msra.gmra.mrb[0].mxu0 %vm418_vm0, %v409_v11  ;;  %p1051_p1 = scmp.ne.s32.totalorder %s1388_s24, %s1050_s13  ;;  %s1129_s16 = smov [#allocation8]  }
  0x68   : > { %p1052_p4 = pnand %p1051_p1, %p1463_p11 }
  0x69   : > { %423 = vadd.xlane.f32.xlu0 %v422_v13 }
  0x6a   : > { %p1053_p5 = pneg %p1052_p4 }
  0xf2   : > { %v421_v14 = vpop.xlane.xlu0 %420 }
  0xf3   : > { %v426_v17 = vadd.f32 %v425_v15, %v421_v14 }
  0xf6   : > { %v424_v16 = vpop.xlane.xlu0 %423 }
  0xf7   : > { %v427_v18 = vadd.f32 %v425_v15, %v424_v16 }
 0x139   : > { %v912_v19 = vpop.f32.mrb[0].mxu0 }
 0x13a   : > { %v503_v20 = vpop.f32.mrb[1].mxu0  ;;  %v509_v22 = vadd.f32 %v912_v19, %v427_v18 }
 0x13b   : > { %v504_v21 = vadd.f32 %v503_v20, %v426_v17 }
 0x13c   : > { %v516_v24 = vsel %vm512_vm1, %v509_v22, -inf }
 0x13d   : > { %v513_v23 = vsel %vm512_vm1, %v504_v21, -inf }
 0x13e   : > { %514 = vmax.xlane.f32.xlu1 %v513_v23 }
 0x142   : > { %517 = vmax.xlane.f32.xlu1 %v516_v24 }
 0x1cb   : > { %v515_v25 = vpop.xlane.xlu1 %514 }
 0x1cc   : > { %v519_v26 = vsub.f32 %v504_v21, %v515_v25 }
 0x1ce   : > { %v521_v27 = vmul.f32 1.442695, %v519_v26 }
 0x1cf   : > { %v518_v28 = vpop.xlane.xlu1 %517 }
 0x1d0   : > { %976 = vpow2.f32 %v521_v27  ;;  %v520_v29 = vsub.f32 %v509_v22, %v518_v28  ;;  %v535_v30 = vmax.f32 %v515_v25, %v518_v28 }
 0x1d2   : > { %v523_v31 = vmul.f32 1.442695, %v520_v29  ;;  %v536_v32 = vrot.slane %v535_v30, 4 }
 0x1d4   : > { %978 = vpow2.f32 %v523_v31  ;;  %v537_v33 = vmax.f32 %v535_v30, %v536_v32 }
 0x1d6   : > { %v538_v34 = vrot.slane %v537_v33, 2 }
 0x1d8   : > { %v539_v35 = vmax.f32 %v537_v33, %v538_v34 }
 0x1da   : > { %v977_v36 = vpop.eup %976  ;;  %v540_v37 = vrot.slane %v539_v35, 1 }
 0x1db   : > { %v525_v38 = vsel %vm512_vm1, %v977_v36, 0.0 }
 0x1dc   : > { %v541_v39 = vmax.f32 %v539_v35, %v540_v37  ;;  %526 = vadd.xlane.f32.xlu0 %v525_v38 }
 0x1de   : > { %v979_v40 = vpop.eup %978  ;;  %v542_v41 = vsub.f32 %v515_v25, %v541_v39  ;;  %v543_v42 = vsub.f32 %v518_v28, %v541_v39 }
 0x1df   : > { %v528_v43 = vsel %vm512_vm1, %v979_v40, 0.0 }
 0x1e0   : > { %v544_v44 = vmul.f32 1.442695, %v542_v41  ;;  %v546_v45 = vmul.f32 1.442695, %v543_v42  ;;  %529 = vadd.xlane.f32.xlu1 %v528_v43 }
 0x1e2   : > { %980 = vpow2.f32 %v544_v44 }
 0x1e3   : > { %982 = vpow2.f32 %v546_v45 }
 0x1ec   : > { %v981_v46 = vpop.eup %980 }
 0x1ed   : > { %v983_v47 = vpop.eup %982 }
 0x1ee   : > { %v548_v48 = vadd.f32 %v983_v47, %v981_v46 }
 0x1f0   : > { %v549_v49 = vrot.slane %v548_v48, 4 }
 0x1f2   : > { %v550_v50 = vadd.f32 %v549_v49, %v548_v48 }
 0x1f4   : > { %v551_v51 = vrot.slane %v550_v50, 2 }
 0x1f6   : > { %v552_v52 = vadd.f32 %v551_v51, %v550_v50 }
 0x1f8   : > { %v553_v53 = vrot.slane %v552_v52, 1 }
 0x1fa   : > { %v554_v54 = vadd.f32 %v553_v53, %v552_v52 }
 0x1fc   : > { %984 = vrcp.f32 %v554_v54 }
 0x206   : > { %v985_v55 = vpop.eup %984 }
 0x207   : > { %v557_v56 = vmul.f32 %v985_v55, %v983_v47  ;;  %v556_v57 = vmul.f32 %v985_v55, %v981_v46 }
 0x209   : > { %654 = vst.msk [vmem:[%s386_s15 + $0x8] sm:$0xff] %vm652_vm2, %v557_v56  ;;  %v639_v58 = vmul.f32 %v556_v57, %v1336_v1  ;;  %v640_v59 = vmul.f32 %v557_v56, %v1338_v2  ;;  %653 = vst.msk [vmem:[%s386_s15] sm:$0xff] %vm652_vm2, %v556_v57  ;;  %s1054_s15 = sshll.u32 %s1129_s16, 4  ;;  %s1055_s15 = int_to_ptr.vmem [resolvable:$false] %s1054_s15 }
 0x20a   : > { %s1056_s28 = scalar_lea.vmem %s1055_s15, 512  ;;  %p1057_p7 = scmp.lt.s32.totalorder %s1388_s24, %s1055_s15 }
 0x20b   : > { %v641_v60 = vsel %vm418_vm0, %v639_v58, 0.0  ;;  %v642_v61 = vsel %vm418_vm0, %v640_v59, 0.0  ;;  %p1058_p9 = scmp.lt.s32.totalorder %s1056_s28, %s1050_s13 }
 0x20c   : > { %v643_v62 = vadd.f32 %v642_v61, %v641_v60 }
 0x20d   : > { %p1059_p3 = por %p1058_p9, %p1057_p7 }
 0x20e   : > { %v644_v7 = vrot.slane %v643_v62, 4 }
 0x20f   : > { %p1060_p12 = pnand %p1059_p3, %p1053_p5 }
 0x210   : > { %v645_v8 = vadd.f32 %v644_v7, %v643_v62 }
 0x212   : > { %v646_v9 = vrot.slane %v645_v8, 2 }
 0x214   : > { %v647_v10 = vadd.f32 %v646_v9, %v645_v8 }
 0x216   : > { %v648_v11 = vrot.slane %v647_v10, 1 }
 0x218   : > { %v649_v13 = vadd.f32 %v648_v11, %v647_v10 }
 0x21a   : > { %v657_v16 = vmul.f32 %v649_v13, %v1336_v1  ;;  %v658_v18 = vmul.f32 %v649_v13, %v1338_v2 }
 0x269   : > { %v527_v63 = vpop.xlane.xlu0 %526 }
 0x26a   : > { %986 = vrcp.f32 %v527_v63 }
 0x26d   : > { %v530_v0 = vpop.xlane.xlu1 %529 }
 0x26e   : > { %988 = vrcp.f32 %v530_v0 }
 0x274   : > { %v987_v3 = vpop.eup %986 }
 0x275   : > { %v533_v4 = vmul.f32 %v987_v3, %v977_v36 }
 0x277   : > { %915 = vmatprep.mubr.msk.f32.mxu1 %vm512_vm1, %v533_v4  ;;  %650 = vst.msk [vmem:[%s381_s14] sm:$0xff] %vm512_vm1, %v533_v4 }
 0x278   : > { %v989_v5 = vpop.eup %988 }
 0x279   : > { %v534_v6 = vmul.f32 %v989_v5, %v979_v40 }
 0x27b   : > { %916 = vmatmul.mubr.msk.f32.vlgmr.msra.gmra.mrb[0].mxu1 %vm512_vm1, %v534_v6  ;;  %651 = vst.msk [vmem:[%s381_s14 + $0x8] sm:$0xff] %vm512_vm1, %v534_v6 }
 0x34e   : > { %v917_v12 = vpop.f32.mrb[0].mxu1 }
 0x34f   : > { %663 = vrot.lane.b32.xlu1 %v917_v12, %s1126_s25  ;;  %v630_v14 = vpop.f32.mrb[1].mxu1  ;;  %v656_v15 = vmul.f32 %v917_v12, %v1338_v2 }
 0x350   : > { %661 = vrot.lane.b32.xlu0 %v630_v14, %s1126_s25  ;;  %v655_v17 = vmul.f32 %v630_v14, %v1336_v1 }
 0x353   : > { %671 = vrot.lane.b32.xlu1 %v656_v15, %s1127_s22 }
 0x354   : > { %677 = vrot.lane.b32.xlu0 %v657_v16, %s1128_s0 }
 0x357   : > { %669 = vrot.lane.b32.xlu1 %v655_v17, %s1127_s22 }
 0x35b   : > { %679 = vrot.lane.b32.xlu1 %v658_v18, %s1128_s0 }
 0x3c1   : > { %v664_v19 = vpop.permute.xlu1 %663 }
 0x3c2   : > { %v662_v20 = vpop.permute.xlu0 %661  ;;  %v684_v27 = vsel %vm418_vm0, %v1338_v2, %v664_v19 }
 0x3c3   : > { %v683_v22 = vsel %vm418_vm0, %v1336_v1, %v662_v20 }
 0x3c5   : > { %v672_v21 = vpop.permute.xlu1 %671 }
 0x3c6   : > { %v678_v24 = vpop.permute.xlu0 %677  ;;  %v687_v1 = vsel %vm685_vm4, %v684_v27, %v672_v21 }
 0x3c9   : > { %v670_v23 = vpop.permute.xlu1 %669 }
 0x3ca   : > { %v686_v25 = vsel %vm685_vm4, %v683_v22, %v670_v23 }
 0x3cb   : > { %v689_v26 = vsel %vm688_vm3, %v686_v25, %v678_v24 }
 0x3cc   : > { %691 = vst [vmem:[%s376_s20] sm:$0xff] %v689_v26 }
 0x3cd   : > { %v680_v28 = vpop.permute.xlu1 %679 }
 0x3ce   : > { %v690_v29 = vsel %vm688_vm3, %v687_v1, %v680_v28 }
 0x3cf   : > { %692 = vst [vmem:[%s376_s20 + $0x8] sm:$0xff] %v690_v29 }
 0x3d0   : > { %1063 = shalt.err (!%p1060_p12)
}
 0x3d1   : > { %s1064_s23 = scalar_lea.hbm %s1396_s21, 256  ;;  %s1068_s22 = scalar_lea.hbm %s1449_s8, 512 }
 0x3d2   : > { %p1065_p8 = scmp.ne.s32.totalorder %s1396_s21, %s1064_s23  ;;  %p1069_p10 = scmp.lt.u32.totalorder %s1396_s21, %s1449_s8 }
 0x3d3   : > { %p1070_p6 = scmp.lt.u32.totalorder %s1068_s22, %s1064_s23  ;;  %p1072_p1 = scmp.lt.u32.totalorder %s1064_s23, %s1396_s21 }
 0x3d4   : > { %p1066_p0 = pnand %p1065_p8, %p1463_p11 }
 0x3d5   : > { %p1071_p13 = por %p1070_p6, %p1069_p10 }
 0x3d6   : > { %p1067_p2 = pneg %p1066_p0 }
 0x3d7   : > { %p1073_p4 = por %p1072_p1, %p1071_p13 }
 0x3d9   : > { %p1074_p5 = pnand %p1073_p4, %p1067_p2 }
 0x3db   : > { %1077 = shalt.err (!%p1074_p5)
}
 0x3dc   : > { %s1130_s17 = smov 128   ;;  %s1131_s11 = smov 8  }
 0x3dd   : > { %922 = dma.vmem_to_hbm [thread:$0]  (%p1463_p11), %s1388_s24, 256, %s1396_s21, %s704_s5, %s1130_s17, %s1130_s17, %s1131_s11  }
 0x3de PF: > { %s754_s26 = sand.u32 1, %s1108_s29   ;;  %p1464_p7 = scmp.ne.s32.totalorder %s1457_s19, 0 }
 0x3df   : > { %p1465_p9 = scmp.ge.s32.totalorder %s1120_s10, 2  ;;  %s755_s13 = scalar_lea.sflag [#allocation5], %s754_s26 }
 0x3e1   : > { %p932_p3 = pnand %p1465_p9, %p1464_p7 }
 0x3e3   : > { %1103 = dma.done.wait (!%p932_p3), %s755_s13, 256  }
 0x3e4   : > { %1105 = vsyncadd (!%p932_p3), %s755_s13, 4294967040  ;;  %s1466_s16 = sld [smem:[#allocation12_spill]]  ;;  %p26_p12 = scmp.ge.s32.totalorder %s1205_s12, 4  }
 0x3e5   : > { %s1467_s29 = smov %s1112_s30  ;;  %s1468_s30 = smov %s1116_s9 }
 0x3e6   : > { %s1470_s10 = smov %s1205_s12  ;;  %28 = sbr.rel (!%p26_p12) target bundleno = 10 (0xa), region = 126 }
 0x3ea   : > { %s1469_s9 = smov %s1466_s16 }
 0x3ed   :  { %760 = vsyncpa [#allocation4], 1 }
 0x3ee   :  { %762 = vsyncpa [#allocation4 + $0x1], 1 }
 0x3ef   :  { %763 = vsyncpa [#allocation7], 1 }
 0x3f0   :  { %765 = vsyncpa [#allocation7 + $0x1], 1 }
 0x3f1   :  { %766 = vsyncpa [#allocation5], 1 }
 0x3f2   :  { %768 = vsyncpa [#allocation5 + $0x1], 1 }

</bundles_post_ra>
